<compile_context>
chip_gen: v7x
topology: tpu7x:2x2x1
jax: 0.10.0
libtpu: 0.0.40
codegen_flags: <defaults>
</compile_context>

<pallas_src>
import functools

import jax
import jax.numpy as jnp
from jax.experimental import pallas as pl
from jax.experimental.pallas import tpu as pltpu


def _round_up(x, m):
    return ((x + m - 1) // m) * m


def _outer_energy_kernel(x_ref, s_ref, out_ref, *, d_valid, tile_d):
    # x_ref  : (TB, TD)  tile of the flattened displacements [ux | uy]
    # s_ref  : (1, TD)   matching tile of the concatenated weights
    # out_ref: (TB, 1)   per-batch-tile accumulator (same block for every k)
    k = pl.program_id(1)

    @pl.when(k == 0)
    def _():
        out_ref[...] = jnp.zeros_like(out_ref)

    prod = x_ref[...].astype(jnp.float32) * s_ref[...].astype(jnp.float32)

    if d_valid % tile_d != 0:
        # Ragged reduction tail: lanes past d_valid in the last k block read
        # unspecified data (possibly NaN/Inf); mask the product explicitly.
        lane = jax.lax.broadcasted_iota(jnp.int32, prod.shape, dimension=1)
        prod = jnp.where(k * tile_d + lane < d_valid, prod, 0.0)

    # TODO(synk): (v5e micro-opt) defer the cross-lane reduce into a (TB, 128)
    # VMEM lane accumulator and fold once at the last k; skipped because the
    # required reshape risks a VMEM relayout and the kernel is HBM-bound.
    out_ref[...] += jnp.sum(prod, axis=-1, keepdims=True)    # (TB, 1)


@functools.partial(jax.jit, static_argnames=("max_tile_b", "max_tile_d"))
def outer_energy(x, s_x, s_y, *, max_tile_b=256, max_tile_d=8192):
    """x: (B, 2, D); s_x, s_y: (D,)  ->  (B,) float32."""
    B, C, D = x.shape
    assert C == 2, "expected 2 displacement channels [ux, uy]"

    D2 = 2 * D
    x2 = x.reshape(B, D2)                                     # free reshape
    # Weights are tiny: cast to f32 once; shape (1, D2) so the kernel multiply
    # broadcasts over batch sublanes.
    s = jnp.concatenate([s_x, s_y], axis=0).astype(jnp.float32)[None, :]

    # ---- Reduction-axis tile: no padding of x; waste < 128 lanes per chunk.
    if D2 <= max_tile_d:
        tile_d = D2                                           # full extent
    else:
        n_k = pl.cdiv(D2, max_tile_d)
        tile_d = _round_up(pl.cdiv(D2, n_k), 128)
    grid_k = pl.cdiv(D2, tile_d)

    # ---- Batch tile: sublane-packed quantum (8 rows/vreg f32, 16 bf16, ...).
    itemsize = jnp.dtype(x.dtype).itemsize
    quantum = max(8, (8 * 4) // max(1, itemsize))
    if B < 2 * quantum:
        tile_b = B                                            # full extent
    else:
        # >= 2 batch blocks so both v7x TensorCores get work; the ragged batch
        # edge is handled by Pallas dropping out-of-bounds output writes.
        tile_b = min(max_tile_b, _round_up(pl.cdiv(B, 2), quantum))
    grid_b = pl.cdiv(B, tile_b)

    grid = (grid_b, grid_k)

    # VMEM budget from actual tile bytes (double-buffered) + slack; always
    # below v7x's 64 MiB physical VMEM.
    x_tile_bytes = tile_b * tile_d * itemsize
    s_tile_bytes = tile_d * 4
    vmem_limit = 2 * (x_tile_bytes + s_tile_bytes + tile_b * 4) + (8 << 20)
    vmem_limit = int(min(max(vmem_limit, 16 << 20), 48 << 20))

    cost = pl.CostEstimate(
        flops=2 * B * D2,
        transcendentals=0,
        bytes_accessed=B * D2 * itemsize + D2 * 4 + B * 4,
    )

    kernel = functools.partial(_outer_energy_kernel, d_valid=D2, tile_d=tile_d)

    out2 = pl.pallas_call(
        kernel,
        out_shape=jax.ShapeDtypeStruct((B, 1), jnp.float32),
        grid_spec=pltpu.PrefetchScalarGridSpec(
            num_scalar_prefetch=0,
            grid=grid,
            in_specs=[
                pl.BlockSpec((tile_b, tile_d), lambda b, k: (b, k)),
                pl.BlockSpec((1, tile_d), lambda b, k: (0, k)),   # streamed weights
            ],
            out_specs=pl.BlockSpec((tile_b, 1), lambda b, k: (b, 0)),
        ),
        compiler_params=pltpu.CompilerParams(
            # batch axis parallel (megacore on v7x); reduction axis last and
            # arbitrary so the resident output block is a valid accumulator.
            dimension_semantics=("parallel", "arbitrary"),
            vmem_limit_bytes=vmem_limit,
        ),
        cost_estimate=cost,
    )(x2, s)
    return out2[:, 0]


if __name__ == "__main__":
    # Small, deterministic synthetic setup: batch=2, N=16 -> D = N*N = 256.
    B, N = 2, 16
    D = N * N

    key = jax.random.PRNGKey(0)
    kx, ksx, ksy = jax.random.split(key, 3)

    x = jax.random.normal(kx, (B, 2, D), dtype=jnp.float32)
    s_x = jax.random.normal(ksx, (D,), dtype=jnp.float32)
    s_y = jax.random.normal(ksy, (D,), dtype=jnp.float32)

    out = outer_energy(x, s_x, s_y)
    out = jax.block_until_ready(out)

    # Pure-JAX reference (same math as the PyTorch einsums).
    ref = x[:, 0, :] @ s_x + x[:, 1, :] @ s_y

    assert out.shape == (B,)
    assert jnp.allclose(out, ref, atol=1e-4, rtol=1e-4), (out, ref)
    print("KERNEL_OK")
</pallas_src>

<mosaic_0001>
module attributes {stable_mosaic.version = 11 : i64} {
  func.func @_outer_energy_kernel(%arg0: i32, %arg1: i32, %arg2: memref<2x512xf32, #tpu.memory_space<vmem>>, %arg3: memref<1x512xf32, #tpu.memory_space<vmem>>, %arg4: memref<2x1xf32, #tpu.memory_space<vmem>>) attributes {dimension_semantics = [#tpu.dimension_semantics<parallel>, #tpu.dimension_semantics<arbitrary>], iteration_bounds = array<i64: 1, 1>, scalar_prefetch = 0 : i64, scratch_operands = 0 : i64, tpu.core_type = #tpu.core_type<tc>, window_params = [{transform_indices = @transform_0, window_bounds = array<i64: 2, 512>}, {transform_indices = @transform_1, window_bounds = array<i64: 1, 512>}, {transform_indices = @transform_2, window_bounds = array<i64: 2, 1>}]} {
    %c0_i32 = arith.constant 0 : i32
    %0 = arith.cmpi eq, %arg1, %c0_i32 : i32
    %1 = arith.extui %0 : i1 to i32
    %c0_i32_0 = arith.constant 0 : i32
    %2 = arith.cmpi ne, %1, %c0_i32_0 : i32
    scf.if %2 {
      %cst_8 = arith.constant 0.000000e+00 : f32
      %12 = vector.broadcast %cst_8 : f32 to vector<2x1xf32>
      %c0_9 = arith.constant 0 : index
      %c0_10 = arith.constant 0 : index
      %13 = vector.load %arg4[%c0_9, %c0_10] : memref<2x1xf32, #tpu.memory_space<vmem>>, vector<2x1xf32>
      tpu.vector_store %arg4[%c0_9, %c0_10], %12 {strides = array<i32>} : memref<2x1xf32, #tpu.memory_space<vmem>>, vector<2x1xf32>,
    } else {
    }
    %c0 = arith.constant 0 : index
    %c0_1 = arith.constant 0 : index
    %3 = vector.load %arg2[%c0, %c0_1] : memref<2x512xf32, #tpu.memory_space<vmem>>, vector<2x512xf32>
    %c0_2 = arith.constant 0 : index
    %c0_3 = arith.constant 0 : index
    %4 = vector.load %arg3[%c0_2, %c0_3] : memref<1x512xf32, #tpu.memory_space<vmem>>, vector<1x512xf32>
    %5 = vector.broadcast %4 : vector<1x512xf32> to vector<2x512xf32>
    %6 = arith.mulf %3, %5 : vector<2x512xf32>
    %c0_4 = arith.constant 0 : index
    %c0_5 = arith.constant 0 : index
    %7 = vector.load %arg4[%c0_4, %c0_5] : memref<2x1xf32, #tpu.memory_space<vmem>>, vector<2x1xf32>
    %cst = arith.constant dense<0.000000e+00> : vector<2xf32>
    %8 = vector.multi_reduction <add>, %6, %cst [1] : vector<2x512xf32> to vector<2xf32>
    %9 = vector.shape_cast %8 : vector<2xf32> to vector<2x1xf32>
    %10 = arith.addf %7, %9 : vector<2x1xf32>
    %c0_6 = arith.constant 0 : index
    %c0_7 = arith.constant 0 : index
    %11 = vector.load %arg4[%c0_6, %c0_7] : memref<2x1xf32, #tpu.memory_space<vmem>>, vector<2x1xf32>
    tpu.vector_store %arg4[%c0_6, %c0_7], %10 {strides = array<i32>} : memref<2x1xf32, #tpu.memory_space<vmem>>, vector<2x1xf32>,
    return
  }
  func.func @transform_0(%arg0: i32, %arg1: i32) -> (i32, i32) {
    %c0_i32 = arith.constant 0 : i32
    return %arg0, %arg1 : i32, i32
  }
  func.func @transform_1(%arg0: i32, %arg1: i32) -> (i32, i32) {
    %c0_i32 = arith.constant 0 : i32
    %c0_i32_0 = arith.constant 0 : i32
    return %c0_i32, %arg1 : i32, i32
  }
  func.func @transform_2(%arg0: i32, %arg1: i32) -> (i32, i32) {
    %c0_i32 = arith.constant 0 : i32
    %c0_i32_0 = arith.constant 0 : i32
    return %arg0, %c0_i32 : i32, i32
  }
}

</mosaic_0001>

<bundles_post_ra>
// kernel: outer_energy.1
= control target key start
LH: loop header
LB: loop body
LE: loop exit
PB: predicated region body
PF: predicated region fallthrough
CT: control target
= control target key end

     0   :  { %v20_v0 = vlaneseq  ;;  %vm15_vm0 = vcmask 1024   ;;  %v97_v1 = vmov 1983009808   ;;  %v98_v4 = vmov 0.0   ;;  %s131_s1 = inlined_call_operand.vmem [shape: f32[1,512], index: 1, kind: input, shape index: {}]   ;;  %s132_s2 = inlined_call_operand.vmem [shape: f32[2,1], index: 2, kind: output, shape index: {}]   ;;  %s133_s0 = inlined_call_operand.vmem [shape: f32[2,512], index: 0, kind: input, shape index: {}]  }
   0x1   :  { %v39_v2 = vunpack.c.l.s4 %v97_v1  ;;  %16 = vst.msk [vmem:[%s132_s2] sm:$0x3] %vm15_vm0, %v98_v4  ;;  %v18_v5 = vld [vmem:[%s131_s1] sm:$0xf]  ;;  %vm78_vm1 = vcmask 1041408  }
   0x2   :  { %v21_v3 = vshrl.u32 %v20_v0, 7  ;;  %v17_v20 = vld [vmem:[%s133_s0] sm:$0xff] }
   0x3   :  { %v40_v6 = vunpack.c.0.s8 %v39_v2 }
   0x4   :  { %v22_v7 = vsub.s32 0, %v21_v3  ;;  %v26_v8 = vsub.s32 1, %v21_v3  ;;  %v30_v9 = vsub.s32 2, %v21_v3  ;;  %v34_v10 = vsub.s32 3, %v21_v3 }
   0x5   :  { %v43_v11 = vsub.s32 %v40_v6, %v21_v3 }
   0x6   :  { %v23_v12 = vrot.slane %v18_v5, %v22_v7  ;;  %v27_v13 = vrot.slane %v18_v5, %v26_v8  ;;  %v31_v14 = vrot.slane %v18_v5, %v30_v9  ;;  %v35_v15 = vrot.slane %v18_v5, %v34_v10 }
   0x8   :  { %v36_v16 = vcombine.low %v23_v12, %v27_v13  ;;  %v37_v17 = vcombine.low %v31_v14, %v35_v15  ;;  %v55_v35 = vld [vmem:[%s132_s2] sm:$0x3] }
   0xa   :  { %v44_v18 = vrot.slane %v36_v16, %v43_v11  ;;  %v51_v19 = vrot.slane %v37_v17, %v43_v11 }
   0xc   :  { %v52_v21 = vcombine.low %v44_v18, %v51_v19 }
   0xe   :  { %v54_v22 = vmul.f32 %v52_v21, %v17_v20 }
  0x10   :  { %v57_v23 = vcombine.high %v54_v22, %v54_v22  ;;  %v64_v24 = vrot.slane %v54_v22, %v43_v11 }
  0x12   :  { %v71_v25 = vrot.slane %v57_v23, %v43_v11  ;;  %v72_v26 = vcombine.high %v64_v24, %v64_v24  ;;  %v79_v27 = vsel %vm78_vm1, %v64_v24, 0.0 }
  0x14   :  { %v73_v28 = vcombine.high %v71_v25, %v71_v25  ;;  %v80_v29 = vsel %vm78_vm1, %v72_v26, 0.0  ;;  %v82_v30 = vsel %vm78_vm1, %v71_v25, 0.0 }
  0x15   :  { %v81_v31 = vadd.f32 %v80_v29, %v79_v27 }
  0x16   :  { %v84_v32 = vsel %vm78_vm1, %v73_v28, 0.0 }
  0x17   :  { %v83_v33 = vadd.f32 %v82_v30, %v81_v31 }
  0x19   :  { %v85_v34 = vadd.f32 %v84_v32, %v83_v33 }
  0x1b   :  { %86 = vadd.xlane.f32.xlu0 %v85_v34 }
  0xa8   :  { %v87_v36 = vpop.xlane.xlu0 %86 }
  0xa9   :  { %v88_v37 = vadd.f32 %v87_v36, %v55_v35 }
  0xab   :  { %90 = vst.msk [vmem:[%s132_s2] sm:$0x3] %vm15_vm0, %v88_v37 }

</bundles_post_ra>
